<compile_context>
chip_gen: v7x
topology: tpu7x:2x2x1
jax: 0.10.0
libtpu: 0.0.40
codegen_flags: <defaults>
</compile_context>

<pallas_src>
import math

import jax
import jax.numpy as jnp
from jax.experimental import pallas as pl
from jax.experimental.pallas import tpu as pltpu


def _build_pe(d_model: int, max_seq_length: int, dtype=jnp.float32) -> jnp.ndarray:
    """Deterministic sinusoidal PE buffer, identical to the PyTorch __init__.

    Built once in the model dtype so the kernel wrapper never has to slice or
    convert it per call."""
    position = jnp.arange(0, max_seq_length, dtype=jnp.float32)[:, None]        # [L, 1]
    div_term = jnp.exp(
        jnp.arange(0, d_model, 2, dtype=jnp.float32) * -(math.log(10000.0) / d_model)
    )                                                                            # [D/2]
    angles = position * div_term                                                 # [L, D/2]
    pe = jnp.zeros((max_seq_length, d_model), dtype=jnp.float32)
    pe = pe.at[:, 0::2].set(jnp.sin(angles))
    pe = pe.at[:, 1::2].set(jnp.cos(angles))
    return pe.astype(dtype)


def _add_pe_rows_kernel(x_ref, pe_ref, o_ref):
    # x_ref/o_ref: (TM, D) row block of one batch element (batch dim squeezed)
    # pe_ref:      (TM, D) matching positional-encoding rows
    o_ref[...] = x_ref[...] + pe_ref[...]


def _add_pe_batched_kernel(x_ref, pe_ref, o_ref):
    # x_ref/o_ref: (TB, S, D) block of several batch rows
    # pe_ref:      (S, D), broadcast over the batch-row axis (single hoisted
    #              broadcast; kernel is DMA-bound so the extra VPU work is free)
    o_ref[...] = x_ref[...] + pe_ref[...][None, :, :]


def _vmem_capacity_bytes() -> int:
    try:
        return int(pltpu.get_tpu_info().vmem_capacity_bytes)
    except Exception:
        return 64 * 1024 * 1024          # conservative (v7x per-TC VMEM)


def _byte_budget():
    """(target bytes per buffer, scoped VMEM limit) picked per chip generation."""
    vmem = _vmem_capacity_bytes()
    if vmem >= 128 * 1024 * 1024:        # v5e / v6e: 128 MiB VMEM
        return 8 * 1024 * 1024, 64 * 1024 * 1024
    return 4 * 1024 * 1024, 32 * 1024 * 1024   # v7x: 64 MiB physical, 32 MiB scoped


def positional_encoding(x: jnp.ndarray, pe: jnp.ndarray, *,
                        donate_x: bool = False,
                        target_bytes: int | None = None):
    """x: [B, S, D], pe: [max_seq_length, D]  ->  [B, S, D]"""
    B, S, D = x.shape
    L = pe.shape[0]
    assert S <= L, f"sequence length {S} exceeds max_seq_length {L}"
    if pe.dtype != x.dtype:
        # Fallback only — prefer building pe in the model dtype via _build_pe so
        # no per-call convert is emitted.  (Note: adding a pre-cast bf16 pe
        # differs from the f32-add-then-cast PyTorch path by <=1 ulp of pe.)
        pe = pe.astype(x.dtype)

    itemsize = jnp.dtype(x.dtype).itemsize
    sub = {4: 8, 2: 16, 1: 32}.get(itemsize, 8)   # sublane packing per dtype

    default_target, vmem_limit = _byte_budget()
    if target_bytes is None:
        target_bytes = default_target

    # Row tile over the sequence axis: biggest sublane-aligned TM with
    # (TM, D) * itemsize <= target_bytes.
    tm = (target_bytes // max(1, D * itemsize)) // sub * sub
    tm = max(sub, tm)
    tm = min(tm, S)
    num_s = pl.cdiv(S, tm)

    # Pass the full pe buffer whenever the (tm, D) blocks are legal on it
    # (no wrapper-side slice/convert round-trip).  tm < S is always a multiple
    # of `sub`; the only unaligned case is tm == S with ragged S.
    if tm % sub == 0 or tm == L:
        pe_arg = pe
    else:
        pe_arg = pe[:S]                  # fallback: keeps the block == full dims

    # Small-shape path: if one batch element's (S, D) slab is far below the
    # budget, block several batch rows per grid step to keep DMAs large.
    if tm == S:
        tb = max(1, min(B, target_bytes // max(1, S * D * itemsize)))
    else:
        tb = 1

    cost = pl.CostEstimate(
        flops=B * S * D,
        transcendentals=0,
        bytes_accessed=(2 * B + 1) * S * D * itemsize,
    )
    cparams = pltpu.CompilerParams(
        dimension_semantics=("parallel", "parallel"),
        vmem_limit_bytes=vmem_limit,
    )
    extra = {"input_output_aliases": {0: 0}} if donate_x else {}

    if tb > 1:
        # Batched-rows path (tm == S here, so num_s == 1).
        grid = (num_s, pl.cdiv(B, tb))
        in_specs = [
            pl.BlockSpec((tb, S, D), lambda s, b: (b, s, 0)),
            pl.BlockSpec((S, D), lambda s, b: (s, 0)),
        ]
        out_spec = pl.BlockSpec((tb, S, D), lambda s, b: (b, s, 0))
        kernel = _add_pe_batched_kernel
    else:
        # Row-tiled path: S-blocks outer, batch inner; pe block index depends
        # only on s, so it is reused (not re-DMA'd) across the inner b axis.
        grid = (num_s, B)
        in_specs = [
            pl.BlockSpec((pl.Squeezed(), tm, D), lambda s, b: (b, s, 0)),
            pl.BlockSpec((tm, D), lambda s, b: (s, 0)),
        ]
        out_spec = pl.BlockSpec((pl.Squeezed(), tm, D), lambda s, b: (b, s, 0))
        kernel = _add_pe_rows_kernel

    return pl.pallas_call(
        kernel,
        out_shape=jax.ShapeDtypeStruct((B, S, D), x.dtype),
        grid=grid,
        in_specs=in_specs,
        out_specs=out_spec,
        compiler_params=cparams,
        cost_estimate=cost,
        **extra,
    )(x, pe_arg)


if __name__ == "__main__":
    d_model = 128          # lane-dense last dim (multiple of 128)
    max_seq_length = 16
    B, S = 2, 8

    pe = _build_pe(d_model, max_seq_length, dtype=jnp.float32)

    key = jax.random.PRNGKey(0)
    x = jax.random.normal(key, (B, S, d_model), dtype=jnp.float32)

    ref = x + pe[None, :S, :]          # pure-JAX reference

    # Default path (small shapes -> batched (TB, S, D) blocks).
    out = jax.block_until_ready(positional_encoding(x, pe))
    assert out.shape == (B, S, d_model)
    assert jnp.allclose(out, ref, atol=1e-6), "mismatch vs reference (batched path)"

    # Also exercise the row-tiled (squeezed batch) path with a tiny byte budget.
    out2 = jax.block_until_ready(positional_encoding(x, pe, target_bytes=4096))
    assert jnp.allclose(out2, ref, atol=1e-6), "mismatch vs reference (row-tiled path)"

    print("KERNEL_OK")
</pallas_src>

<mosaic_0001>
module attributes {stable_mosaic.version = 11 : i64} {
  func.func @_add_pe_batched_kernel(%arg0: i32, %arg1: i32, %arg2: memref<2x8x128xf32, #tpu.memory_space<vmem>>, %arg3: memref<8x128xf32, #tpu.memory_space<vmem>>, %arg4: memref<2x8x128xf32, #tpu.memory_space<vmem>>) attributes {dimension_semantics = [#tpu.dimension_semantics<parallel>, #tpu.dimension_semantics<parallel>], iteration_bounds = array<i64: 1, 1>, scalar_prefetch = 0 : i64, scratch_operands = 0 : i64, tpu.core_type = #tpu.core_type<tc>, window_params = [{transform_indices = @transform_0, window_bounds = array<i64: 2, 8, 128>}, {transform_indices = @transform_1, window_bounds = array<i64: 8, 128>}, {transform_indices = @transform_2, window_bounds = array<i64: 2, 8, 128>}]} {
    %c0 = arith.constant 0 : index
    %c0_0 = arith.constant 0 : index
    %c0_1 = arith.constant 0 : index
    %0 = vector.load %arg2[%c0, %c0_0, %c0_1] : memref<2x8x128xf32, #tpu.memory_space<vmem>>, vector<2x8x128xf32>
    %c0_2 = arith.constant 0 : index
    %c0_3 = arith.constant 0 : index
    %1 = vector.load %arg3[%c0_2, %c0_3] : memref<8x128xf32, #tpu.memory_space<vmem>>, vector<8x128xf32>
    %2 = vector.shape_cast %1 : vector<8x128xf32> to vector<1x8x128xf32>
    %3 = vector.broadcast %2 : vector<1x8x128xf32> to vector<2x8x128xf32>
    %4 = arith.addf %0, %3 : vector<2x8x128xf32>
    %c0_4 = arith.constant 0 : index
    %c0_5 = arith.constant 0 : index
    %c0_6 = arith.constant 0 : index
    %5 = vector.load %arg4[%c0_4, %c0_5, %c0_6] : memref<2x8x128xf32, #tpu.memory_space<vmem>>, vector<2x8x128xf32>
    tpu.vector_store %arg4[%c0_4, %c0_5, %c0_6], %4 {strides = array<i32>} : memref<2x8x128xf32, #tpu.memory_space<vmem>>, vector<2x8x128xf32>,
    return
  }
  func.func @transform_0(%arg0: i32, %arg1: i32) -> (i32, i32, i32) {
    %c0_i32 = arith.constant 0 : i32
    %c0_i32_0 = arith.constant 0 : i32
    return %arg1, %arg0, %c0_i32 : i32, i32, i32
  }
  func.func @transform_1(%arg0: i32, %arg1: i32) -> (i32, i32) {
    %c0_i32 = arith.constant 0 : i32
    %c0_i32_0 = arith.constant 0 : i32
    return %arg0, %c0_i32 : i32, i32
  }
  func.func @transform_2(%arg0: i32, %arg1: i32) -> (i32, i32, i32) {
    %c0_i32 = arith.constant 0 : i32
    %c0_i32_0 = arith.constant 0 : i32
    return %arg1, %arg0, %c0_i32 : i32, i32, i32
  }
}

</mosaic_0001>

<bundles_post_ra>
// kernel: tpu_custom_call.1
= control target key start
LH: loop header
LB: loop body
LE: loop exit
PB: predicated region body
PF: predicated region fallthrough
CT: control target
= control target key end

     0   :  { %7 = vsyncpa [#allocation3], 0  ;;  %s205_s0 = inlined_call_operand.hbm [shape: f32[2,8,128], index: 0, kind: input, shape index: {}]   ;;  %s206_s1 = inlined_call_operand.hbm [shape: f32[16,128], index: 1, kind: input, shape index: {}]   ;;  %s207_s2 = inlined_call_operand.hbm [shape: f32[2,8,128], index: 2, kind: output, shape index: {}]  }
   0x1   :  { %8 = vsyncpa [#allocation6], 0 }
   0x2   :  { %9 = vsyncpa [#allocation4], 0  ;;  %s140_s9 = smov [#allocation2]   ;;  %s68_s13 = scalar_lea.hbm %s205_s0, 256 }
   0x3   :  { %s15_s10 = sshll.u32 %s140_s9, 4  ;;  %p69_p0 = scmp.ne.s32.totalorder %s205_s0, %s68_s13  ;;  %s16_s10 = int_to_ptr.vmem [resolvable:$true] %s15_s10 }
   0x4   :  { %p72_p1 = scmp.lt.u32.totalorder %s68_s13, %s205_s0 }
   0x6   :  { %p74_p2 = pnand %p72_p1, %p69_p0 }
   0x8   :  { %77 = shalt.err (!%p74_p2)
}
   0x9   :  { %s78_s18 = scalar_lea.vmem %s16_s10, 256  ;;  %p83_p4 = scmp.lt.s32.totalorder %s16_s10, %s16_s10 }
   0xa   :  { %p79_p3 = scmp.ne.s32.totalorder %s16_s10, %s78_s18  ;;  %p84_p5 = scmp.lt.s32.totalorder %s78_s18, %s78_s18 }
   0xc   :  { %p85_p6 = por %p84_p5, %p83_p4 }
   0xe   :  { %p86_p7 = pnand %p85_p6, %p79_p3 }
  0x10   :  { %89 = shalt.err (!%p86_p7)
}
  0x11   :  { %s141_s19 = smov 128   ;;  %s142_s20 = smov 8  }
  0x12   :  { %21 = dma.hbm_to_vmem [thread:$0]  %s205_s0, 256, %s16_s10, [#allocation3], %s141_s19, %s141_s19, %s142_s20  }
  0x13   :  { %s143_s23 = smov [#allocation5]   ;;  %s90_s27 = scalar_lea.hbm %s206_s1, 128 }
  0x14   :  { %s28_s24 = sshll.u32 %s143_s23, 4  ;;  %p91_p8 = scmp.ne.s32.totalorder %s206_s1, %s90_s27  ;;  %s29_s24 = int_to_ptr.vmem [resolvable:$true] %s28_s24 }
  0x15   :  { %s92_s4 = scalar_lea.hbm %s206_s1, 256  ;;  %p94_p10 = scmp.lt.u32.totalorder %s90_s27, %s206_s1 }
  0x16   :  { %p93_p9 = scmp.lt.u32.totalorder %s92_s4, %s90_s27 }
  0x18   :  { %p95_p11 = por %p94_p10, %p93_p9 }
  0x1a   :  { %p96_p12 = pnand %p95_p11, %p91_p8 }
  0x1c   :  { %99 = shalt.err (!%p96_p12)
}
  0x1d   :  { %s100_s0 = scalar_lea.vmem %s29_s24, 128  ;;  %p105_p0 = scmp.lt.s32.totalorder %s29_s24, %s29_s24 }
  0x1e   :  { %p101_p13 = scmp.ne.s32.totalorder %s29_s24, %s100_s0  ;;  %p106_p1 = scmp.lt.s32.totalorder %s100_s0, %s100_s0 }
  0x20   :  { %p107_p2 = por %p106_p1, %p105_p0 }
  0x22   :  { %p108_p3 = pnand %p107_p2, %p101_p13 }
  0x24   :  { %111 = shalt.err (!%p108_p3)
}
  0x25   :  { %31 = dma.hbm_to_vmem [thread:$0]  %s206_s1, 128, %s29_s24, [#allocation6]  }
  0x26   :  { %134 = dma.done.wait [#allocation3], 256  }
  0x27   :  { %135 = vsyncadd [#allocation3], 4294967040 }
  0x28   :  { %136 = dma.done.wait [#allocation6], 128  }
  0x29   :  { %137 = vsyncadd [#allocation6], 4294967168  ;;  %s144_s9 = smov [#allocation7]   ;;  %v38_v0 = vld [vmem:[#allocation2] sm:$0xff]  ;;  %v40_v1 = vld [vmem:[#allocation5] sm:$0xff] }
  0x2a   :  { %s50_s10 = sshll.u32 %s144_s9, 4  ;;  %v39_v2 = vld [vmem:[#allocation2 + $0x8] sm:$0xff]  ;;  %v41_v3 = vadd.f32 %v40_v1, %v38_v0  ;;  %s51_s10 = int_to_ptr.vmem [resolvable:$true] %s50_s10 }
  0x2b   :  { %v42_v4 = vadd.f32 %v40_v1, %v39_v2  ;;  %s112_s11 = scalar_lea.vmem %s51_s10, 256  ;;  %p117_p5 = scmp.lt.s32.totalorder %s51_s10, %s51_s10 }
  0x2c   :  { %43 = vst [vmem:[#allocation7] sm:$0xff] %v41_v3  ;;  %p113_p4 = scmp.ne.s32.totalorder %s51_s10, %s112_s11  ;;  %p118_p6 = scmp.lt.s32.totalorder %s112_s11, %s112_s11 }
  0x2d   :  { %44 = vst [vmem:[#allocation7 + $0x8] sm:$0xff] %v42_v4 }
  0x2e   :  { %p119_p7 = por %p118_p6, %p117_p5 }
  0x30   :  { %p120_p8 = pnand %p119_p7, %p113_p4 }
  0x32   :  { %123 = shalt.err (!%p120_p8)
}
  0x33   :  { %s124_s13 = scalar_lea.hbm %s207_s2, 256 }
  0x34   :  { %p125_p9 = scmp.ne.s32.totalorder %s207_s2, %s124_s13  ;;  %p128_p10 = scmp.lt.u32.totalorder %s124_s13, %s207_s2 }
  0x36   :  { %p130_p11 = pnand %p128_p10, %p125_p9 }
  0x38   :  { %133 = shalt.err (!%p130_p11)
}
  0x39   :  { %56 = dma.vmem_to_hbm [thread:$0]  %s51_s10, 256, %s207_s2, [#allocation4], %s141_s19, %s141_s19, %s142_s20  }
  0x3a   :  { %138 = dma.done.wait [#allocation4], 256  }
  0x3b   :  { %139 = vsyncadd [#allocation4], 4294967040 }
  0x3c   :  { %60 = vsyncpa [#allocation3], 1 }
  0x3d   :  { %61 = vsyncpa [#allocation6], 1 }
  0x3e   :  { %62 = vsyncpa [#allocation4], 1 }

</bundles_post_ra>
